<compile_context>
chip_gen: v7x
topology: tpu7x:2x2x1
jax: 0.10.0
libtpu: 0.0.40
codegen_flags: <defaults>
</compile_context>

<pallas_src>
import functools

import jax
import jax.numpy as jnp
from jax.experimental import pallas as pl
from jax.experimental.pallas import tpu as pltpu


# ---------------------------------------------------------------------------
# Kernels
# ---------------------------------------------------------------------------
def _recover_kernel_lowres_lr(x_ref, lr_ref, o_ref, *, r, wh):
    """x_ref/o_ref: (TM, r*Wh); lr_ref: (TM, Wl).  W-repeat done in-kernel."""
    lr = lr_ref[...]                                             # native dtype
    # Nearest-neighbour repeat along W (lane interleave), computed once per
    # tile and reused for all r high-res rows below.
    lr_rep = jnp.repeat(lr, r, axis=1, total_repeat_length=wh)   # (TM, Wh)
    for a in range(r):                     # static unroll: H replication
        sl = pl.ds(a * wh, wh)
        o_ref[:, sl] = x_ref[:, sl] * lr_rep


def _recover_kernel_wrepeated_lr(x_ref, lr_ref, o_ref, *, r, wh):
    """x_ref/o_ref: (TM, r*Wh); lr_ref: (TM, Wh) (already W-repeated)."""
    lr = lr_ref[...]                                             # (TM, Wh)
    for a in range(r):                     # static unroll: H replication
        sl = pl.ds(a * wh, wh)
        o_ref[:, sl] = x_ref[:, sl] * lr


# ---------------------------------------------------------------------------
# Sizing helpers
# ---------------------------------------------------------------------------
def _vmem_capacity_bytes():
    try:
        return int(pltpu.get_tpu_info().vmem_capacity_bytes)
    except Exception:
        return 64 * 1024 * 1024            # conservative (v7x-sized) default


def _pick_tile_rows(rows, row_bytes, itemsize, vmem_cap):
    """Sublane-aligned row-block size targeting big streaming tiles."""
    # ~8 MiB x-tiles on 128 MiB-VMEM parts (v5e/v6e), ~4 MiB on 64 MiB (v7x).
    target = (8 if vmem_cap >= 96 * 1024 * 1024 else 4) * 1024 * 1024
    sub = max(8, 32 // max(1, itemsize))   # 8 f32 / 16 bf16 / 32 int8
    tm = max(1, target // max(1, row_bytes))
    tm = min(tm, rows)
    if rows < sub:
        return rows                        # tiny array: one full block
    tm = max(sub, (tm // sub) * sub)
    # Keep at least two row blocks when possible so the "parallel" grid axis
    # can shard across both TensorCores on v7x.
    half = (rows // 2) // sub * sub
    if half >= sub:
        tm = min(tm, half)
    return tm


# ---------------------------------------------------------------------------
# pallas_call wrapper
# ---------------------------------------------------------------------------
_LOWRES_LR_LOWERS = {}   # (dtype, Wl, r) -> bool memo for the guarded path


def _run_pallas(x2, lr_in, *, r, wh, tm, lowres_lr, donate_x, vmem_cap):
    rows, cols = x2.shape
    itemsize = x2.dtype.itemsize
    xb = tm * cols * itemsize
    lb = tm * lr_in.shape[1] * itemsize
    # Double-buffered x-in, out and lr-in, plus headroom for in-kernel temps.
    need = 2 * (2 * xb + lb)
    vmem_limit = max(32 * 1024 * 1024, int(need * 1.25) + (8 << 20))
    vmem_limit = min(vmem_limit, max(32 * 1024 * 1024, vmem_cap - (16 << 20)))

    kernel = functools.partial(
        _recover_kernel_lowres_lr if lowres_lr else _recover_kernel_wrepeated_lr,
        r=r, wh=wh)

    cost = pl.CostEstimate(
        flops=rows * cols,                                  # one mul / element
        transcendentals=0,
        bytes_accessed=2 * rows * cols * itemsize + lr_in.size * itemsize)

    lr_cols = lr_in.shape[1]
    return pl.pallas_call(
        kernel,
        out_shape=jax.ShapeDtypeStruct((rows, cols), x2.dtype),
        grid=(pl.cdiv(rows, tm),),
        in_specs=[
            pl.BlockSpec((tm, cols), lambda i: (i, 0)),      # x: lane-dense
            pl.BlockSpec((tm, lr_cols), lambda i: (i, 0)),   # lr
        ],
        out_specs=pl.BlockSpec((tm, cols), lambda i: (i, 0)),
        compiler_params=pltpu.CompilerParams(
            dimension_semantics=("parallel",),
            vmem_limit_bytes=vmem_limit,
        ),
        cost_estimate=cost,
        input_output_aliases={0: 0} if donate_x else {},
    )(x2, lr_in)


def recover_from_density(x, lr_img, upscale_factor, *, donate_x=False):
    """Pallas TPU equivalent of Recover_from_density.forward(x, lr_img).

    x: (N, C, H*r, W*r), lr_img: (N, C, H, W) -> x * nearest_upsample(lr_img).
    Set donate_x=True only if the caller no longer needs x.
    """
    r = int(upscale_factor)
    N, C, Hh, Wh = x.shape
    Nl, Cl, Hl, Wl = lr_img.shape
    assert (N, C) == (Nl, Cl) and Hh == Hl * r and Wh == Wl * r, "shape mismatch"

    rows = N * C * Hl            # one row per low-res image row
    cols = r * Wh                # its r high-res rows, concatenated in lanes

    lr_img = lr_img.astype(x.dtype)      # multiply in x's native dtype
    x2 = x.reshape(rows, cols)           # zero-copy lane-dense view

    itemsize = jnp.dtype(x.dtype).itemsize
    vmem_cap = _vmem_capacity_bytes()
    tm = _pick_tile_rows(rows, cols * itemsize, itemsize, vmem_cap)

    # Preferred path: low-res lr + in-kernel W interleave (saves ~2/r of x's
    # HBM bytes).  Attempted only for lane-aligned low-res widths and guarded
    # by a fallback in case Mosaic rejects/relayouts the lane interleave.
    key = (str(jnp.dtype(x.dtype)), int(Wl), r)
    if r > 1 and Wl % 128 == 0 and _LOWRES_LR_LOWERS.get(key, True):
        try:
            out2 = _run_pallas(x2, lr_img.reshape(rows, Wl), r=r, wh=Wh, tm=tm,
                               lowres_lr=True, donate_x=donate_x,
                               vmem_cap=vmem_cap)
            _LOWRES_LR_LOWERS[key] = True
            return out2.reshape(N, C, Hh, Wh)
        except Exception:
            _LOWRES_LR_LOWERS[key] = False   # fall back to W-repeated lr

    # Fallback path: repeat lr along W once in the wrapper (1/r of x's bytes).
    lr_w = jnp.repeat(lr_img, r, axis=3).reshape(rows, Wh)
    out2 = _run_pallas(x2, lr_w, r=r, wh=Wh, tm=tm,
                       lowres_lr=False, donate_x=donate_x, vmem_cap=vmem_cap)
    return out2.reshape(N, C, Hh, Wh)


if __name__ == "__main__":
    # Small deterministic example consistent with the module's forward:
    # upscale_factor = 4, lr_img is (N, C, H, W), x is (N, C, H*r, W*r).
    upscale_factor = 4
    N, C, Hl, Wl = 2, 4, 4, 4
    Hh, Wh = Hl * upscale_factor, Wl * upscale_factor

    key = jax.random.PRNGKey(0)
    kx, kl = jax.random.split(key)
    x = jax.random.normal(kx, (N, C, Hh, Wh), dtype=jnp.float32)
    lr_img = jax.random.normal(kl, (N, C, Hl, Wl), dtype=jnp.float32)

    out = recover_from_density(x, lr_img, upscale_factor)
    out = jax.block_until_ready(out)

    # Reference: nearest-neighbor upsample (torch.nn.Upsample(mode='nearest'))
    # followed by elementwise multiply.
    up_ref = jnp.repeat(jnp.repeat(lr_img, upscale_factor, axis=2),
                        upscale_factor, axis=3)
    expected = x * up_ref

    assert out.shape == x.shape and out.dtype == x.dtype
    assert jnp.allclose(out, expected, atol=1e-6, rtol=1e-6)

    print("KERNEL_OK")
</pallas_src>

<mosaic_0001>
module attributes {stable_mosaic.version = 11 : i64} {
  func.func @_recover_kernel_wrepeated_lr(%arg0: i32, %arg1: memref<16x64xf32, #tpu.memory_space<vmem>>, %arg2: memref<16x16xf32, #tpu.memory_space<vmem>>, %arg3: memref<16x64xf32, #tpu.memory_space<vmem>>) attributes {dimension_semantics = [#tpu.dimension_semantics<parallel>], iteration_bounds = array<i64: 2>, scalar_prefetch = 0 : i64, scratch_operands = 0 : i64, tpu.core_type = #tpu.core_type<tc>, window_params = [{transform_indices = @transform_0, window_bounds = array<i64: 16, 64>}, {transform_indices = @transform_1, window_bounds = array<i64: 16, 16>}, {transform_indices = @transform_2, window_bounds = array<i64: 16, 64>}]} {
    %c0 = arith.constant 0 : index
    %c0_0 = arith.constant 0 : index
    %0 = vector.load %arg2[%c0, %c0_0] : memref<16x16xf32, #tpu.memory_space<vmem>>, vector<16x16xf32>
    %c0_1 = arith.constant 0 : index
    %c0_2 = arith.constant 0 : index
    %1 = vector.load %arg1[%c0_1, %c0_2] : memref<16x64xf32, #tpu.memory_space<vmem>>, vector<16x16xf32>
    %2 = arith.mulf %1, %0 : vector<16x16xf32>
    %c0_3 = arith.constant 0 : index
    %c0_4 = arith.constant 0 : index
    %3 = vector.load %arg3[%c0_3, %c0_4] : memref<16x64xf32, #tpu.memory_space<vmem>>, vector<16x16xf32>
    tpu.vector_store %arg3[%c0_3, %c0_4], %2 {strides = array<i32>} : memref<16x64xf32, #tpu.memory_space<vmem>>, vector<16x16xf32>,
    %c0_5 = arith.constant 0 : index
    %c16 = arith.constant 16 : index
    %4 = vector.load %arg1[%c0_5, %c16] : memref<16x64xf32, #tpu.memory_space<vmem>>, vector<16x16xf32>
    %5 = arith.mulf %4, %0 : vector<16x16xf32>
    %c0_6 = arith.constant 0 : index
    %c16_7 = arith.constant 16 : index
    %6 = vector.load %arg3[%c0_6, %c16_7] : memref<16x64xf32, #tpu.memory_space<vmem>>, vector<16x16xf32>
    tpu.vector_store %arg3[%c0_6, %c16_7], %5 {strides = array<i32>} : memref<16x64xf32, #tpu.memory_space<vmem>>, vector<16x16xf32>,
    %c0_8 = arith.constant 0 : index
    %c32 = arith.constant 32 : index
    %7 = vector.load %arg1[%c0_8, %c32] : memref<16x64xf32, #tpu.memory_space<vmem>>, vector<16x16xf32>
    %8 = arith.mulf %7, %0 : vector<16x16xf32>
    %c0_9 = arith.constant 0 : index
    %c32_10 = arith.constant 32 : index
    %9 = vector.load %arg3[%c0_9, %c32_10] : memref<16x64xf32, #tpu.memory_space<vmem>>, vector<16x16xf32>
    tpu.vector_store %arg3[%c0_9, %c32_10], %8 {strides = array<i32>} : memref<16x64xf32, #tpu.memory_space<vmem>>, vector<16x16xf32>,
    %c0_11 = arith.constant 0 : index
    %c48 = arith.constant 48 : index
    %10 = vector.load %arg1[%c0_11, %c48] : memref<16x64xf32, #tpu.memory_space<vmem>>, vector<16x16xf32>
    %11 = arith.mulf %10, %0 : vector<16x16xf32>
    %c0_12 = arith.constant 0 : index
    %c48_13 = arith.constant 48 : index
    %12 = vector.load %arg3[%c0_12, %c48_13] : memref<16x64xf32, #tpu.memory_space<vmem>>, vector<16x16xf32>
    tpu.vector_store %arg3[%c0_12, %c48_13], %11 {strides = array<i32>} : memref<16x64xf32, #tpu.memory_space<vmem>>, vector<16x16xf32>,
    return
  }
  func.func @transform_0(%arg0: i32) -> (i32, i32) {
    %c0_i32 = arith.constant 0 : i32
    %c0_i32_0 = arith.constant 0 : i32
    return %arg0, %c0_i32 : i32, i32
  }
  func.func @transform_1(%arg0: i32) -> (i32, i32) {
    %c0_i32 = arith.constant 0 : i32
    %c0_i32_0 = arith.constant 0 : i32
    return %arg0, %c0_i32 : i32, i32
  }
  func.func @transform_2(%arg0: i32) -> (i32, i32) {
    %c0_i32 = arith.constant 0 : i32
    %c0_i32_0 = arith.constant 0 : i32
    return %arg0, %c0_i32 : i32, i32
  }
}

</mosaic_0001>

<bundles_post_ra>
// kernel: tpu_custom_call.1
= control target key start
LH: loop header
LB: loop body
LE: loop exit
PB: predicated region body
PF: predicated region fallthrough
CT: control target
= control target key end

     0   :  { %7 = vsyncpa [#allocation3], 0  ;;  %s569_s0 = inlined_call_operand.vmem [shape: f32[32,64], index: 0, kind: input, shape index: {}]   ;;  %s570_s1 = inlined_call_operand.vmem [shape: f32[32,16], index: 1, kind: input, shape index: {}]   ;;  %s571_s2 = inlined_call_operand.hbm [shape: f32[32,64], index: 2, kind: output, shape index: {}]  }
   0x1   :  { %9 = vsyncpa [#allocation3 + $0x1], 0  ;;  %s449_s9 = smov 0   ;;  %s451_s10 = smov 0  }
   0x2   :  { %s453_s11 = smov 0   ;;  %s455_s12 = smov 0  }
   0x3 LB: > { %s470_s13 = sadd.s32 4294967295, %s426_s12   ;;  %s305_s14 = sadd.s32 4294967294, %s426_s12   ;;  %s426_s12 = sphi %s455_s12, %s577_s12   ;;  %s422_s11 = sphi %s453_s11, %s576_s11   ;;  %s418_s10 = sphi %s451_s10, %s575_s10   ;;  %s414_s9 = sphi %s449_s9, %s574_s9  }
   0x4   : > { %s474_s15 = sadd.s32 1, %s426_s12   ;;  %s74_s16 = sadd.s32 1, %s422_s11 }
   0x5   : > { %s71_s17 = ssub.s32 %s426_s12, %s474_s15  ;;  %p84_p0 = scmp.ne.s32.totalorder %s422_s11, %s418_s10 }
   0x6   : > { %p72_p1 = scmp.eq.s32.totalorder %s71_s17, 0  ;;  %p85_p2 = scmp.eq.s32.totalorder %s470_s13, 1 }
   0x7   : > { %p90_p3 = scmp.ne.s32.totalorder %s418_s10, %s414_s9  ;;  %p91_p4 = scmp.eq.s32.totalorder %s305_s14, 1 }
   0x8   : > { %s485_s18 = scalar_select %p72_p1, %s422_s11, %s74_s16  }
   0x9   : > { %p487_p5 = por %p85_p2, %p84_p0  ;;  %p491_p6 = por %p91_p4, %p90_p3 }
   0xa   : > { %p308_p7 = scmp.ge.s32.totalorder %s426_s12, 1  ;;  %p127_p8 = scmp.lt.s32.totalorder %s426_s12, 3 }
   0xc   : > { %p128_p9 = pnand %p308_p7, %p127_p8 }
   0xd   : > { %s310_s21 = sshll.u32 (!%p128_p9), %s470_s13, 1  ;;  %s151_s22 = sand.u32 (!%p128_p9), 1, %s418_s10   ;;  %vm173_vm0 = vcmask (!%p128_p9), 130048   ;;  %vm188_vm1 = vcmask (!%p128_p9), 261248   ;;  %vm201_vm2 = vcmask (!%p128_p9), 392448   ;;  %vm214_vm3 = vcmask (!%p128_p9), 523648  }
   0xe   : > { %131 = sbr.rel (%p128_p9) target bundleno = 165 (0xa5), region = 28  ;;  %p155_p10 = scmp.lt.s32.totalorder (!%p128_p9), %s310_s21, 3 }
   0xf   : > { %s309_s23 = sshll.u32 (!%p128_p9), %s151_s22, 4  ;;  %s428_s3 = smov (!%p128_p9), 32  }
  0x10   : > { %s429_s4 = smov (!%p128_p9), 16   ;;  %s507_s5 = scalar_lea.vmem (!%p128_p9), [#allocation2], %s309_s23 }
  0x11   : > { %s430_s6 = smov (!%p128_p9), 48   ;;  %s319_s7 = sshll.u32 (!%p128_p9), %s470_s13, 8 }
  0x12   : > { %s231_s8 = sshll.u32 (!%p128_p9), %s507_s5, 4  ;;  %s520_s17 = scalar_lea.hbm (!%p128_p9), %s571_s2, %s319_s7  ;;  %s522_s8 = int_to_ptr.vmem [resolvable:$true] %s231_s8 }
  0x13   : > { %s528_s13 = scalar_lea.sflag (!%p128_p9), [#allocation3], %s151_s22  ;;  %s431_s23 = smov (!%p128_p9), [#allocation2]  }
  0x15   : > { %s579_s21 = smov (!%p155_p10, %s310_s21), 3 }
  0x16   : > { %s311_s24 = sshll.u32 %s579_s21, 3  ;;  %s364_s21 = scalar_lea.vmem %s522_s8, 256 }
  0x17   : > { %s164_s27 = scalar_lea.vmem %s570_s1, %s311_s24  ;;  %s158_s30 = scalar_lea.vmem %s569_s0, %s311_s24 }
  0x18   : > { %v167_v0 = vld [vmem:[%s164_s27] sm:$0xff]  ;;  %v168_v3 = vld [vmem:[%s164_s27 + $0x8] sm:$0xff]  ;;  %p365_p11 = scmp.ne.s32.totalorder %s522_s8, %s364_s21  ;;  %s368_s24 = sshll.u32 %s431_s23, 4  ;;  %s369_s24 = int_to_ptr.vmem [resolvable:$false] %s368_s24 }
  0x19   : > { %v169_v1 = vld [vmem:[%s158_s30] sm:$0xff]  ;;  %193 = vrot.lane.b32.xlu1 %v167_v0, %s428_s3  ;;  %180 = vrot.lane.b32.xlu0 %v167_v0, %s429_s4  ;;  %v170_v4 = vld [vmem:[%s158_s30 + $0x8] sm:$0xff]  ;;  %s370_s25 = scalar_lea.vmem %s369_s24, 512  ;;  %p371_p0 = scmp.lt.s32.totalorder %s522_s8, %s369_s24 }
  0x1a   : > { %v171_v2 = vmul.f32 %v169_v1, %v167_v0  ;;  %v172_v5 = vmul.f32 %v170_v4, %v168_v3  ;;  %p366_p12 = pnand %p365_p11, %p487_p5  ;;  %p372_p1 = scmp.lt.s32.totalorder %s370_s25, %s364_s21 }
  0x1c   : > { %174 = vst.msk [vmem:[%s507_s5] sm:$0xff] %vm173_vm0, %v171_v2  ;;  %175 = vst.msk [vmem:[%s507_s5 + $0x8] sm:$0xff] %vm173_vm0, %v172_v5  ;;  %p367_p13 = pneg %p366_p12  ;;  %p373_p2 = por %p372_p1, %p371_p0 }
  0x1d   : > { %195 = vrot.lane.b32.xlu1 %v168_v3, %s428_s3  ;;  %182 = vrot.lane.b32.xlu0 %v168_v3, %s429_s4 }
  0x1e   : > { %p374_p3 = pnand %p373_p2, %p367_p13 }
  0x21   : > { %208 = vrot.lane.b32.xlu1 %v168_v3, %s430_s6  ;;  %206 = vrot.lane.b32.xlu0 %v167_v0, %s430_s6 }
  0x8b   : > { %v194_v6 = vpop.permute.xlu1 %193  ;;  %v181_v7 = vpop.permute.xlu0 %180 }
  0x8c   : > { %v199_v8 = vmul.f32 %v194_v6, %v169_v1  ;;  %v186_v9 = vmul.f32 %v181_v7, %v169_v1 }
  0x8e   : > { %189 = vst.msk [vmem:[%s507_s5] sm:$0xff] %vm188_vm1, %v186_v9 }
  0x8f   : > { %v196_v10 = vpop.permute.xlu1 %195  ;;  %v183_v11 = vpop.permute.xlu0 %182  ;;  %202 = vst.msk [vmem:[%s507_s5] sm:$0xff] %vm201_vm2, %v199_v8 }
  0x90   : > { %v200_v12 = vmul.f32 %v196_v10, %v170_v4  ;;  %v187_v13 = vmul.f32 %v183_v11, %v170_v4 }
  0x92   : > { %190 = vst.msk [vmem:[%s507_s5 + $0x8] sm:$0xff] %vm188_vm1, %v187_v13 }
  0x93   : > { %v209_v14 = vpop.permute.xlu1 %208  ;;  %203 = vst.msk [vmem:[%s507_s5 + $0x8] sm:$0xff] %vm201_vm2, %v200_v12  ;;  %v207_v15 = vpop.permute.xlu0 %206 }
  0x94   : > { %v213_v16 = vmul.f32 %v209_v14, %v170_v4  ;;  %v212_v17 = vmul.f32 %v207_v15, %v169_v1 }
  0x96   : > { %216 = vst.msk [vmem:[%s507_s5 + $0x8] sm:$0xff] %vm214_vm3, %v213_v16  ;;  %215 = vst.msk [vmem:[%s507_s5] sm:$0xff] %vm214_vm3, %v212_v17 }
  0x97   : > { %377 = shalt.err (!%p374_p3)
}
  0x98   : > { %s378_s22 = scalar_lea.hbm %s520_s17, 256  ;;  %s382_s28 = scalar_lea.hbm %s571_s2, 512 }
  0x99   : > { %p379_p4 = scmp.ne.s32.totalorder %s520_s17, %s378_s22  ;;  %p383_p9 = scmp.lt.u32.totalorder %s520_s17, %s571_s2 }
  0x9a   : > { %p384_p10 = scmp.lt.u32.totalorder %s382_s28, %s378_s22  ;;  %p386_p12 = scmp.lt.u32.totalorder %s378_s22, %s520_s17 }
  0x9b   : > { %p380_p7 = pnand %p379_p4, %p487_p5 }
  0x9c   : > { %p385_p11 = por %p384_p10, %p383_p9 }
  0x9d   : > { %p381_p8 = pneg %p380_p7 }
  0x9e   : > { %p387_p13 = por %p386_p12, %p385_p11 }
  0xa0   : > { %p388_p0 = pnand %p387_p13, %p381_p8 }
  0xa2   : > { %391 = shalt.err (!%p388_p0)
}
  0xa3   : > { %s432_s3 = smov 128   ;;  %s433_s4 = smov 8  }
  0xa4   : > { %320 = dma.vmem_to_hbm [thread:$0]  (%p487_p5), %s522_s8, 256, %s520_s17, %s528_s13, %s432_s3, %s432_s3, %s433_s4  }
  0xa5 PF: > { %p326_p1 = scmp.ge.s32.totalorder %s426_s12, 2  ;;  %s246_s5 = sand.u32 1, %s414_s9  }
  0xa6   : > { %s247_s6 = scalar_lea.sflag [#allocation3], %s246_s5 }
  0xa7   : > { %p323_p2 = pnand %p326_p1, %p491_p6 }
  0xa9   : > { %409 = dma.done.wait (!%p323_p2), %s247_s6, 256  }
  0xaa   : > { %411 = vsyncadd (!%p323_p2), %s247_s6, 4294967040  ;;  %p12_p3 = scmp.ge.s32.totalorder %s474_s15, 4   ;;  %s574_s9 = smov %s418_s10 }
  0xab   : > { %s575_s10 = smov %s422_s11  ;;  %s576_s11 = smov %s485_s18 }
  0xac   : > { %s577_s12 = smov %s474_s15  ;;  %14 = sbr.rel (!%p12_p3) target bundleno = 3 (0x3), region = 66 }
  0xb3   :  { %252 = vsyncpa [#allocation3], 1 }
  0xb4   :  { %254 = vsyncpa [#allocation3 + $0x1], 1 }

</bundles_post_ra>
